<compile_context>
chip_gen: v7x
topology: tpu7x:2x2x1
jax: 0.10.0
libtpu: 0.0.40
codegen_flags: <defaults>
</compile_context>

<pallas_src>
import jax
import jax.numpy as jnp
from jax import lax
from jax.experimental import pallas as pl
from jax.experimental.pallas import tpu as pltpu


def embedding_model_forward(token_embeddings, attention_mask, *,
                            batch_tile=None, seq_tile=None,
                            vmem_limit_bytes=32 * 1024 * 1024):
    """Masked mean pooling + L2 normalization (EmbeddingModel.forward tail).

    token_embeddings: [B, S, H]  backbone last_hidden_state, native HBM dtype
    attention_mask:   [B, S]     1 = real token, 0 = padding (int/bool)
    returns:          [B, H]     float32, L2-normalized sentence embeddings
    """
    B, S, H = token_embeddings.shape
    emb_dtype = token_embeddings.dtype
    itemsize = jnp.dtype(emb_dtype).itemsize

    # ---------------- tile selection (never pads the [B,S,H] stream) -------
    if batch_tile is None:
        bt = min(8, B)
        # v7x has 2 TensorCores; give the "parallel" batch axis >= 2 blocks
        # whenever the batch allows it.
        if B > 1 and pl.cdiv(B, bt) < 2:
            bt = pl.cdiv(B, 2)
    else:
        bt = batch_tile
    bt = max(1, min(bt, B))

    if seq_tile is None:
        # seq tiles are multiples of 128 => emb/mask BlockSpecs are always
        # legal with no padding; cap the emb buffer at ~8 MiB so the
        # double-buffered stream stays comfortably inside scoped VMEM on all
        # generations (v5e 16 MiB default is raised via vmem_limit_bytes).
        ts = 1024
        while ts > 128 and bt * ts * H * itemsize > 8 * 1024 * 1024:
            ts //= 2
        while bt > 1 and 2 * bt * ts * H * itemsize > 16 * 1024 * 1024:
            bt = max(1, bt // 2)
    else:
        ts = seq_tile
    if ts >= S:
        ts = S                      # one seq block == full extent (always legal)
    assert ts == S or ts % 128 == 0, "seq_tile must be a multiple of 128 (or >= S)"

    num_bb = pl.cdiv(B, bt)
    n_seq = pl.cdiv(S, ts)
    seq_rem = S % ts                # >0 only when the last seq block is ragged

    # Per-batch-block number of seq tiles containing any attended position;
    # later tiles contribute nothing, so their DMA and compute are skipped.
    # (Based on the last nonzero mask position -> exact for arbitrary masks.)
    pos = jnp.arange(S, dtype=jnp.int32)[None, :]
    last_pos = jnp.max(jnp.where(attention_mask != 0, pos + 1, 0), axis=1)   # [B]
    last_pos = jnp.pad(last_pos, (0, num_bb * bt - B))
    nblk = jnp.minimum(
        (jnp.max(last_pos.reshape(num_bb, bt), axis=1) + ts - 1) // ts,
        n_seq).astype(jnp.int32)                                             # [num_bb]

    # Metadata-only reshape: mask gets a unit dim so its last two block dims
    # equal the full array dims (any batch_tile / any S is legal, no pad).
    mask3 = attention_mask.reshape(B, 1, S)

    def kernel(nblk_ref, emb_ref, mask_ref, out_ref, cnt_ref):
        bi = pl.program_id(0)
        si = pl.program_id(1)
        last_si = pl.num_programs(1) - 1

        @pl.when(si == 0)
        def _init():
            out_ref[...] = jnp.zeros_like(out_ref)
            cnt_ref[...] = jnp.zeros_like(cnt_ref)

        @pl.when(si < nblk_ref[bi])          # skip fully-padded seq tiles
        def _accumulate():
            if seq_rem:
                # The last seq block reads past S; Pallas leaves that region
                # undefined.  Zero it in place so zero weights cannot turn
                # NaN/Inf garbage into NaN through the contraction.
                @pl.when(si == last_si)
                def _zero_tail():
                    emb_ref[:, seq_rem:, :] = jnp.zeros(
                        (bt, ts - seq_rem, H), emb_dtype)

            maskv = mask_ref[...]                                    # [bt,1,ts]
            posv = si * ts + lax.broadcasted_iota(jnp.int32, (bt, 1, ts), 2)
            w = jnp.where(posv < S, maskv.astype(jnp.float32), 0.0)  # [bt,1,ts]

            # Masked sum over this seq tile: batched [1,ts]x[ts,H] contraction
            # with f32 accumulation; emb stays in its native HBM dtype.
            partial = lax.dot_general(
                w.astype(emb_dtype), emb_ref[...],
                dimension_numbers=(((2,), (1,)), ((0,), (0,))),
                preferred_element_type=jnp.float32)                  # [bt,1,H]
            out_ref[...] += partial
            cnt_ref[...] += jnp.sum(w, axis=2, keepdims=True)        # [bt,1,1]

        @pl.when(si == last_si)
        def _finalize():
            # torch.clamp(mask.sum(1), min=1e-9); the approx reciprocal's
            # per-row scale error cancels under the subsequent L2 normalize.
            denom = jnp.maximum(cnt_ref[...], 1e-9)
            pooled = out_ref[...] * pl.reciprocal(denom, approx=True)
            # F.normalize(pooled, p=2, dim=1): x / max(||x||_2, 1e-12)
            sq = jnp.sum(pooled * pooled, axis=-1, keepdims=True)
            inv_norm = pl.reciprocal(jnp.maximum(jnp.sqrt(sq), 1e-12),
                                     approx=False)
            out_ref[...] = pooled * inv_norm

    # index_maps: for skipped steps return the previous block index so the
    # DMA is elided (buffer revisit); prefetch ref arrives positionally.
    def emb_map(bi, si, nblk_ref):
        si_eff = jnp.minimum(si, jnp.maximum(nblk_ref[bi] - 1, 0))
        return (bi, si_eff, 0)

    def mask_map(bi, si, nblk_ref):
        si_eff = jnp.minimum(si, jnp.maximum(nblk_ref[bi] - 1, 0))
        return (bi, 0, si_eff)

    def out_map(bi, si, nblk_ref):
        return (bi, 0, 0)

    cost = pl.CostEstimate(
        flops=2 * B * S * H,
        transcendentals=0,
        bytes_accessed=(token_embeddings.size * itemsize
                        + attention_mask.size
                        * jnp.dtype(attention_mask.dtype).itemsize
                        + B * H * 4))

    out = pl.pallas_call(
        kernel,
        out_shape=jax.ShapeDtypeStruct((B, 1, H), jnp.float32),
        grid_spec=pltpu.PrefetchScalarGridSpec(
            num_scalar_prefetch=1,
            grid=(num_bb, n_seq),
            in_specs=[
                pl.BlockSpec((bt, ts, H), emb_map),      # token embeddings
                pl.BlockSpec((bt, 1, ts), mask_map),     # attention mask
            ],
            out_specs=pl.BlockSpec((bt, 1, H), out_map),
            scratch_shapes=[pltpu.VMEM((bt, 1, 1), jnp.float32)],  # token count
        ),
        compiler_params=pltpu.CompilerParams(
            dimension_semantics=("parallel", "arbitrary"),
            vmem_limit_bytes=vmem_limit_bytes),
        cost_estimate=cost,
    )(nblk, token_embeddings, mask3)

    return out.reshape(B, H)


def _reference_forward(token_embeddings, attention_mask):
    """Pure-JAX reference mirroring the PyTorch forward semantics."""
    emb = token_embeddings.astype(jnp.float32)
    mask = attention_mask.astype(jnp.float32)[:, :, None]
    summed = jnp.sum(emb * mask, axis=1)
    denom = jnp.maximum(jnp.sum(mask, axis=1), 1e-9)
    pooled = summed / denom
    norm = jnp.sqrt(jnp.sum(pooled * pooled, axis=-1, keepdims=True))
    return pooled / jnp.maximum(norm, 1e-12)


if __name__ == "__main__":
    # Small, deliberately unaligned shapes; no padding copies are ever made.
    B, S, H, V = 4, 200, 96, 512

    key = jax.random.PRNGKey(0)
    k_emb, k_ids, k_len = jax.random.split(key, 3)

    # TODO(synk): the pretrained transformer backbone that produces
    # last_hidden_state has no in-script equivalent; a deterministic bf16
    # embedding-table lookup stands in for it (plain-JAX glue).
    embed_table = (jax.random.normal(k_emb, (V, H), dtype=jnp.float32)
                   * 0.02).astype(jnp.bfloat16)
    input_ids = jax.random.randint(k_ids, (B, S), 0, V, dtype=jnp.int32)
    lengths = jax.random.randint(k_len, (B,), 3, S + 1, dtype=jnp.int32)
    attention_mask = (jnp.arange(S)[None, :] < lengths[:, None]).astype(jnp.int32)

    token_embeddings = embed_table[input_ids]          # [B,S,H] bf16, stays bf16

    # Forced small seq tile: exercises multi-tile accumulation, the ragged
    # last seq block, and padded-tile skipping.
    out = embedding_model_forward(token_embeddings, attention_mask, seq_tile=128)
    out = jax.block_until_ready(out)

    ref = _reference_forward(token_embeddings, attention_mask)
    assert out.shape == (B, H) and out.dtype == jnp.float32
    assert jnp.allclose(out, ref, atol=1e-4, rtol=1e-4), \
        float(jnp.max(jnp.abs(out - ref)))
    assert jnp.allclose(jnp.linalg.norm(out, axis=1), 1.0, atol=1e-4)

    # Auto-selected tiles (single full-extent seq block for this small S).
    out2 = jax.block_until_ready(
        embedding_model_forward(token_embeddings, attention_mask))
    assert jnp.allclose(out2, ref, atol=1e-4, rtol=1e-4)

    print("KERNEL_OK")
</pallas_src>

<mosaic_0001>
module attributes {stable_mosaic.version = 11 : i64} {
  func.func @kernel(%arg0: i32, %arg1: i32, %arg2: memref<2xi32, #tpu.memory_space<smem>>, %arg3: memref<2x128x96xbf16, #tpu.memory_space<vmem>>, %arg4: memref<2x1x128xi32, #tpu.memory_space<vmem>>, %arg5: memref<2x1x96xf32, #tpu.memory_space<vmem>>, %arg6: memref<2x1x1xf32, #tpu.memory_space<vmem>>) attributes {dimension_semantics = [#tpu.dimension_semantics<parallel>, #tpu.dimension_semantics<arbitrary>], iteration_bounds = array<i64: 2, 2>, scalar_prefetch = 1 : i64, scratch_operands = 1 : i64, tpu.core_type = #tpu.core_type<tc>, window_params = [{transform_indices = @transform_0, window_bounds = array<i64: 2, 128, 96>}, {transform_indices = @transform_1, window_bounds = array<i64: 2, 1, 128>}, {transform_indices = @transform_2, window_bounds = array<i64: 2, 1, 96>}]} {
    %c0_i32 = arith.constant 0 : i32
    %0 = arith.cmpi eq, %arg1, %c0_i32 : i32
    %1 = arith.extui %0 : i1 to i32
    %c0_i32_0 = arith.constant 0 : i32
    %2 = arith.cmpi ne, %1, %c0_i32_0 : i32
    scf.if %2 {
      %cst = arith.constant 0.000000e+00 : f32
      %11 = vector.broadcast %cst : f32 to vector<2x1x96xf32>
      %c0 = arith.constant 0 : index
      %c0_3 = arith.constant 0 : index
      %c0_4 = arith.constant 0 : index
      %12 = vector.load %arg5[%c0, %c0_3, %c0_4] : memref<2x1x96xf32, #tpu.memory_space<vmem>>, vector<2x1x96xf32>
      tpu.vector_store %arg5[%c0, %c0_3, %c0_4], %11 {strides = array<i32>} : memref<2x1x96xf32, #tpu.memory_space<vmem>>, vector<2x1x96xf32>,
      %cst_5 = arith.constant 0.000000e+00 : f32
      %13 = vector.broadcast %cst_5 : f32 to vector<2x1x1xf32>
      %c0_6 = arith.constant 0 : index
      %c0_7 = arith.constant 0 : index
      %c0_8 = arith.constant 0 : index
      %14 = vector.load %arg6[%c0_6, %c0_7, %c0_8] : memref<2x1x1xf32, #tpu.memory_space<vmem>>, vector<2x1x1xf32>
      tpu.vector_store %arg6[%c0_6, %c0_7, %c0_8], %13 {strides = array<i32>} : memref<2x1x1xf32, #tpu.memory_space<vmem>>, vector<2x1x1xf32>,
    } else {
    }
    %3 = arith.index_cast %arg0 : i32 to index
    %4 = memref.load %arg2[%3] : memref<2xi32, #tpu.memory_space<smem>>
    %5 = arith.cmpi slt, %arg1, %4 : i32
    %6 = arith.extui %5 : i1 to i32
    %c0_i32_1 = arith.constant 0 : i32
    %7 = arith.cmpi ne, %6, %c0_i32_1 : i32
    scf.if %7 {
      %c1_i32_3 = arith.constant 1 : i32
      %11 = arith.cmpi eq, %arg1, %c1_i32_3 : i32
      %12 = arith.extui %11 : i1 to i32
      %c0_i32_4 = arith.constant 0 : i32
      %13 = arith.cmpi ne, %12, %c0_i32_4 : i32
      scf.if %13 {
        %cst_24 = arith.constant 0.000000e+00 : bf16
        %35 = vector.broadcast %cst_24 : bf16 to vector<2x56x96xbf16>
        %c0_25 = arith.constant 0 : index
        %c72 = arith.constant 72 : index
        %c0_26 = arith.constant 0 : index
        %36 = vector.load %arg3[%c0_25, %c72, %c0_26] : memref<2x128x96xbf16, #tpu.memory_space<vmem>>, vector<2x56x96xbf16>
        tpu.vector_store %arg3[%c0_25, %c72, %c0_26], %35 {strides = array<i32>} : memref<2x128x96xbf16, #tpu.memory_space<vmem>>, vector<2x56x96xbf16>,
      } else {
      }
      %c0 = arith.constant 0 : index
      %c0_5 = arith.constant 0 : index
      %c0_6 = arith.constant 0 : index
      %14 = vector.load %arg4[%c0, %c0_5, %c0_6] : memref<2x1x128xi32, #tpu.memory_space<vmem>>, vector<2x1x128xi32>
      %c128_i32 = arith.constant 128 : i32
      %15 = arith.muli %arg1, %c128_i32 : i32
      %16 = tpu.iota {dimensions = array<i32: 2>} : vector<2x1x128xi32>
      %17 = vector.broadcast %15 : i32 to vector<2x1x128xi32>
      %18 = arith.addi %17, %16 : vector<2x1x128xi32>
      %c200_i32 = arith.constant 200 : i32
      %19 = vector.broadcast %c200_i32 : i32 to vector<2x1x128xi32>
      %20 = arith.cmpi slt, %18, %19 : vector<2x1x128xi32>
      %21 = arith.sitofp %14 : vector<2x1x128xi32> to vector<2x1x128xf32>
      %cst = arith.constant 0.000000e+00 : f32
      %22 = vector.broadcast %cst : f32 to vector<2x1x128xf32>
      %23 = arith.select %20, %21, %22 : vector<2x1x128xi1>, vector<2x1x128xf32>
      %24 = arith.truncf %23 : vector<2x1x128xf32> to vector<2x1x128xbf16>
      %c0_7 = arith.constant 0 : index
      %c0_8 = arith.constant 0 : index
      %c0_9 = arith.constant 0 : index
      %25 = vector.load %arg3[%c0_7, %c0_8, %c0_9] : memref<2x128x96xbf16, #tpu.memory_space<vmem>>, vector<2x128x96xbf16>
      %cst_10 = arith.constant dense<0.000000e+00> : vector<2x1x96xf32>
      %26 = tpu.matmul %24, %25, %cst_10 {dimension_numbers = #tpu.dot_dimension_numbers<[2], [1], [1], [2], [0, 0, 0, 1, 1, 2], [0], [0]>} : vector<2x1x128xbf16>, vector<2x128x96xbf16>, vector<2x1x96xf32> -> vector<2x1x96xf32>
      %c0_11 = arith.constant 0 : index
      %c0_12 = arith.constant 0 : index
      %c0_13 = arith.constant 0 : index
      %27 = vector.load %arg5[%c0_11, %c0_12, %c0_13] : memref<2x1x96xf32, #tpu.memory_space<vmem>>, vector<2x1x96xf32>
      %28 = arith.addf %27, %26 : vector<2x1x96xf32>
      %c0_14 = arith.constant 0 : index
      %c0_15 = arith.constant 0 : index
      %c0_16 = arith.constant 0 : index
      %29 = vector.load %arg5[%c0_14, %c0_15, %c0_16] : memref<2x1x96xf32, #tpu.memory_space<vmem>>, vector<2x1x96xf32>
      tpu.vector_store %arg5[%c0_14, %c0_15, %c0_16], %28 {strides = array<i32>} : memref<2x1x96xf32, #tpu.memory_space<vmem>>, vector<2x1x96xf32>,
      %c0_17 = arith.constant 0 : index
      %c0_18 = arith.constant 0 : index
      %c0_19 = arith.constant 0 : index
      %30 = vector.load %arg6[%c0_17, %c0_18, %c0_19] : memref<2x1x1xf32, #tpu.memory_space<vmem>>, vector<2x1x1xf32>
      %cst_20 = arith.constant dense<0.000000e+00> : vector<2x1xf32>
      %31 = vector.multi_reduction <add>, %23, %cst_20 [2] : vector<2x1x128xf32> to vector<2x1xf32>
      %32 = vector.shape_cast %31 : vector<2x1xf32> to vector<2x1x1xf32>
      %33 = arith.addf %30, %32 : vector<2x1x1xf32>
      %c0_21 = arith.constant 0 : index
      %c0_22 = arith.constant 0 : index
      %c0_23 = arith.constant 0 : index
      %34 = vector.load %arg6[%c0_21, %c0_22, %c0_23] : memref<2x1x1xf32, #tpu.memory_space<vmem>>, vector<2x1x1xf32>
      tpu.vector_store %arg6[%c0_21, %c0_22, %c0_23], %33 {strides = array<i32>} : memref<2x1x1xf32, #tpu.memory_space<vmem>>, vector<2x1x1xf32>,
    } else {
    }
    %c1_i32 = arith.constant 1 : i32
    %8 = arith.cmpi eq, %arg1, %c1_i32 : i32
    %9 = arith.extui %8 : i1 to i32
    %c0_i32_2 = arith.constant 0 : i32
    %10 = arith.cmpi ne, %9, %c0_i32_2 : i32
    scf.if %10 {
      %c0 = arith.constant 0 : index
      %c0_3 = arith.constant 0 : index
      %c0_4 = arith.constant 0 : index
      %11 = vector.load %arg6[%c0, %c0_3, %c0_4] : memref<2x1x1xf32, #tpu.memory_space<vmem>>, vector<2x1x1xf32>
      %cst = arith.constant 9.99999971E-10 : f32
      %12 = vector.broadcast %cst : f32 to vector<2x1x1xf32>
      %13 = arith.maximumf %11, %12 : vector<2x1x1xf32>
      %c0_5 = arith.constant 0 : index
      %c0_6 = arith.constant 0 : index
      %c0_7 = arith.constant 0 : index
      %14 = vector.load %arg5[%c0_5, %c0_6, %c0_7] : memref<2x1x96xf32, #tpu.memory_space<vmem>>, vector<2x1x96xf32>
      %15 = tpu.reciprocal %13 {approx = true} : vector<2x1x1xf32> -> vector<2x1x1xf32>
      %16 = vector.broadcast %15 : vector<2x1x1xf32> to vector<2x1x96xf32>
      %17 = arith.mulf %14, %16 : vector<2x1x96xf32>
      %18 = arith.mulf %17, %17 : vector<2x1x96xf32>
      %cst_8 = arith.constant dense<0.000000e+00> : vector<2x1xf32>
      %19 = vector.multi_reduction <add>, %18, %cst_8 [2] : vector<2x1x96xf32> to vector<2x1xf32>
      %20 = vector.shape_cast %19 : vector<2x1xf32> to vector<2x1x1xf32>
      %21 = math.sqrt %20 : vector<2x1x1xf32>
      %cst_9 = arith.constant 9.99999996E-13 : f32
      %22 = vector.broadcast %cst_9 : f32 to vector<2x1x1xf32>
      %23 = arith.maximumf %21, %22 : vector<2x1x1xf32>
      %24 = tpu.reciprocal %23 : vector<2x1x1xf32> -> vector<2x1x1xf32>
      %25 = vector.broadcast %24 : vector<2x1x1xf32> to vector<2x1x96xf32>
      %26 = arith.mulf %17, %25 : vector<2x1x96xf32>
      %c0_10 = arith.constant 0 : index
      %c0_11 = arith.constant 0 : index
      %c0_12 = arith.constant 0 : index
      %27 = vector.load %arg5[%c0_10, %c0_11, %c0_12] : memref<2x1x96xf32, #tpu.memory_space<vmem>>, vector<2x1x96xf32>
      tpu.vector_store %arg5[%c0_10, %c0_11, %c0_12], %26 {strides = array<i32>} : memref<2x1x96xf32, #tpu.memory_space<vmem>>, vector<2x1x96xf32>,
    } else {
    }
    return
  }
  func.func @transform_0(%arg0: i32, %arg1: i32, %arg2: memref<2xi32, #tpu.memory_space<smem>>) -> (i32, i32, i32) {
    %0 = arith.index_cast %arg0 : i32 to index
    %1 = memref.load %arg2[%0] : memref<2xi32, #tpu.memory_space<smem>>
    %c1_i32 = arith.constant 1 : i32
    %2 = arith.subi %1, %c1_i32 : i32
    %c0_i32 = arith.constant 0 : i32
    %3 = arith.maxsi %2, %c0_i32 : i32
    %4 = arith.minsi %arg1, %3 : i32
    %c0_i32_0 = arith.constant 0 : i32
    %c0_i32_1 = arith.constant 0 : i32
    return %arg0, %4, %c0_i32_0 : i32, i32, i32
  }
  func.func @transform_1(%arg0: i32, %arg1: i32, %arg2: memref<2xi32, #tpu.memory_space<smem>>) -> (i32, i32, i32) {
    %0 = arith.index_cast %arg0 : i32 to index
    %1 = memref.load %arg2[%0] : memref<2xi32, #tpu.memory_space<smem>>
    %c1_i32 = arith.constant 1 : i32
    %2 = arith.subi %1, %c1_i32 : i32
    %c0_i32 = arith.constant 0 : i32
    %3 = arith.maxsi %2, %c0_i32 : i32
    %4 = arith.minsi %arg1, %3 : i32
    %c0_i32_0 = arith.constant 0 : i32
    %c0_i32_1 = arith.constant 0 : i32
    return %arg0, %c0_i32_0, %4 : i32, i32, i32
  }
  func.func @transform_2(%arg0: i32, %arg1: i32, %arg2: memref<2xi32, #tpu.memory_space<smem>>) -> (i32, i32, i32) {
    %c0_i32 = arith.constant 0 : i32
    %c0_i32_0 = arith.constant 0 : i32
    %c0_i32_1 = arith.constant 0 : i32
    return %arg0, %c0_i32, %c0_i32_0 : i32, i32, i32
  }
}

</mosaic_0001>

<bundles_post_ra>
// kernel: tpu_custom_call.1
= control target key start
LH: loop header
LB: loop body
LE: loop exit
PB: predicated region body
PF: predicated region fallthrough
CT: control target
= control target key end

     0   :  { %s2098_s0 = inlined_call_operand.vmem [shape: s32[2], index: 0, kind: input, shape index: {}]   ;;  %s2099_s1 = inlined_call_operand.vmem [shape: bf16[4,200,96], index: 1, kind: input, shape index: {}]   ;;  %s2100_s2 = inlined_call_operand.vmem [shape: s32[4,1,200], index: 2, kind: input, shape index: {}]   ;;  %s2101_s3 = inlined_call_operand.hbm [shape: f32[4,1,96], index: 3, kind: output, shape index: {}]  }
   0x1   :  { %2105 = sst [smem:[#allocation16_spill]] %s2099_s1  ;;  %s8_s14 = sshll.u32 %s2098_s0, 4  ;;  %s9_s14 = int_to_ptr.vmem [resolvable:$true] %s8_s14 }
   0x2   :  { %2106 = sst [smem:[#allocation17_spill]] %s2101_s3  ;;  %s1408_s15 = scalar_lea.vmem %s9_s14, 16 }
   0x3   :  { %p1409_p0 = scmp.ne.s32.totalorder %s9_s14, %s1408_s15  ;;  %p1413_p1 = scmp.lt.s32.totalorder %s9_s14, %s9_s14 }
   0x4   :  { %p1414_p2 = scmp.lt.s32.totalorder %s1408_s15, %s1408_s15 }
   0x6   :  { %p1415_p3 = por %p1414_p2, %p1413_p1 }
   0x8   :  { %p1416_p4 = pnand %p1415_p3, %p1409_p0 }
   0xa   :  { %1419 = shalt.err (!%p1416_p4)  }
   0xb   :  { %s1614_s16 = smov [#allocation4]  }
   0xc   :  { %11 = dma.vmem_to_smem %s9_s14, 16, %s1614_s16, [#allocation3] }
   0xd   :  { %1528 = dma.done.wait [#allocation3], 16 }
   0xe   :  { %1529 = vsyncadd [#allocation3], 4294967280 }
   0xf   :  { %13 = sfence }
  0x10   :  { %14 = vsyncpa [#allocation8], 0 }
  0x11   :  { %16 = vsyncpa [#allocation8 + $0x1], 0  ;;  %s1646_s17 = smov 0   ;;  %s1648_s18 = smov 0  }
  0x12   :  { %s1650_s0 = smov 0   ;;  %s1652_s19 = smov 0  }
  0x13   :  { %s1654_s20 = smov 0   ;;  %s1656_s21 = smov 0  }
  0x14   :  { %s1658_s22 = smov 0   ;;  %s1660_s23 = smov 0  }
  0x15   :  { %s1662_s24 = smov 0   ;;  %s1664_s25 = smov 0  }
  0x16   :  { %s1666_s26 = smov 0   ;;  %s1668_s27 = smov 0  }
  0x17 LB: > { %2107 = sst [smem:[#allocation11_spill]] %s1564_s23  ;;  %s1075_s28 = sadd.s32 4294967295, %s1580_s27   ;;  %s1580_s27 = sphi %s1668_s27, %s22_s27   ;;  %s1576_s26 = sphi %s1666_s26, %s2144_s26   ;;  %s1572_s25 = sphi %s1664_s25, %s2143_s25   ;;  %s1568_s24 = sphi %s1662_s24, %s2142_s24   ;;  %s1564_s23 = sphi %s1660_s23, %s2141_s23   ;;  %s1560_s22 = sphi %s1658_s22, %s2140_s22   ;;  %s1556_s21 = sphi %s1656_s21, %s2139_s21   ;;  %s1552_s20 = sphi %s1654_s20, %s2138_s20   ;;  %s1548_s19 = sphi %s1652_s19, %s2137_s19   ;;  %s1544_s0 = sphi %s1650_s0, %s2136_s0   ;;  %s1540_s18 = sphi %s1648_s18, %s2135_s18   ;;  %s1536_s17 = sphi %s1646_s17, %s2134_s17  }
  0x18   : > { %2108 = sst [smem:[#allocation12_spill]] %s1568_s24  ;;  %s31_s30 = sadd.s32 1, %s1572_s25 }
  0x19   : > { %s34_s4 = sadd.s32 1, %s1576_s26  ;;  %p32_p5 = scmp.ge.s32.totalorder %s31_s30, 2 }
  0x1a   : > { %s38_s5 = sld [smem:[#allocation4 + %s1576_s26]]  ;;  %p62_p6 = scmp.ne.s32.totalorder %s1560_s22, %s1556_s21 }
  0x1b   : > { %s2146_s30 = smov (%p32_p5, %s31_s30), 0  ;;  %s2148_s4 = smov (!%p32_p5, %s34_s4), %s1576_s26 }
  0x1c   : > { %2109 = sst [smem:[#allocation13_spill]] %s2146_s30  ;;  %p63_p7 = scmp.eq.s32.totalorder %s1580_s27, 0 }
  0x1d   : > { %s78_s7 = sld [smem:[#allocation4 + %s1576_s26]]  ;;  %p36_p8 = scmp.ge.s32.totalorder %s2148_s4, 2 }
  0x1e   : > { %p1722_p9 = por %p63_p7, %p62_p6  ;;  %p102_p11 = scmp.ne.s32.totalorder %s1552_s20, %s1548_s19 }
  0x1f   : > { %s2150_s4 = smov (%p36_p8, %s2148_s4), 0  ;;  %s121_s8 = sadd.s32 1, %s1544_s0 }
  0x20   : > { %s1077_s9 = sadd.s32 4294967295, %s38_s5  ;;  %2111 = sst [smem:[#allocation14_spill]] %s2150_s4 }
  0x21   : > { %p40_p10 = scmp.gt.s32.totalorder %s1077_s9, 0  ;;  %s44_s11 = sld [smem:[#allocation4 + %s2150_s4]] }
  0x22   : > { %s1733_s12 = ssub.s32 %s1576_s26, %s2150_s4  ;;  %s84_s14 = sld [smem:[#allocation4 + %s2150_s4]] }
  0x23   : > { %s2152_s9 = smov (!%p40_p10, %s1077_s9), 0  ;;  %s1079_s13 = sadd.s32 4294967295, %s78_s7 }
  0x24   : > { %p42_p12 = scmp.lt.s32.totalorder %s1572_s25, %s2152_s9  ;;  %p80_p13 = scmp.gt.s32.totalorder %s1079_s13, 0 }
  0x25   : > { %p1739_p0 = por %p102_p11, %p63_p7  ;;  %p119_p1 = scmp.eq.s32.totalorder %s1733_s12, 0 }
  0x26   : > { %s43_s16 = scalar_select %p42_p12, %s1572_s25, %s2152_s9 }
  0x27   : > { %s1078_s5 = sadd.s32 4294967295, %s44_s11  ;;  %p131_p3 = scmp.ne.s32.totalorder %s1544_s0, %s1540_s18 }
  0x28   : > { %p46_p2 = scmp.gt.s32.totalorder %s1078_s5, 0  ;;  %s2154_s13 = smov (!%p80_p13, %s1079_s13), 0 }
  0x29   : > { %p82_p4 = scmp.lt.s32.totalorder %s1572_s25, %s2154_s13  ;;  %s1080_s7 = sadd.s32 4294967295, %s84_s14 }
  0x2a   : > { %s2156_s5 = smov (!%p46_p2, %s1078_s5), 0  ;;  %p86_p6 = scmp.gt.s32.totalorder %s1080_s7, 0 }
  0x2b   : > { %p48_p5 = scmp.lt.s32.totalorder %s2146_s30, %s2156_s5  ;;  %p132_p7 = scmp.eq.s32.totalorder %s1075_s28, 3 }
  0x2c   : > { %s83_s9 = scalar_select %p82_p4, %s1572_s25, %s2154_s13 }
  0x2d   : > { %s49_s11 = scalar_select %p48_p5, %s2146_s30, %s2156_s5 }
  0x2e   : > { %s2158_s7 = smov (!%p86_p6, %s1080_s7), 0  ;;  %p1759_p11 = por %p132_p7, %p131_p3 }
  0x2f   : > { %s51_s29 = ssub.s32 %s43_s16, %s49_s11  ;;  %p88_p8 = scmp.lt.s32.totalorder %s2146_s30, %s2158_s7 }
  0x30   : > { %s52_s6 = sor.u32 %s51_s29, %s1733_s12  ;;  %s2114_s3 = sadd.s32 1, %s1560_s22 }
  0x31   : > { %p53_p10 = scmp.eq.s32.totalorder %s52_s6, 0  ;;  %p137_p12 = scmp.ne.s32.totalorder %s1540_s18, %s1536_s17 }
  0x32   : > { %s89_s4 = scalar_select %p88_p8, %s2146_s30, %s2158_s7 }
  0x33   : > { %s1767_s13 = scalar_select %p53_p10, %s1560_s22, %s2114_s3  }
  0x34   : > { %s91_s24 = ssub.s32 %s83_s9, %s89_s4  ;;  %s2116_s23 = sadd.s32 4294967294, %s1580_s27  }
  0x35   : > { %2115 = sst [smem:[#allocation15_spill]] %s1767_s13  ;;  %s92_s5 = sor.u32 %s91_s24, %s1733_s12 }
  0x36   : > { %p138_p13 = scmp.eq.s32.totalorder %s2116_s23, 3  ;;  %p93_p2 = scmp.eq.s32.totalorder %s92_s5, 0 }
  0x37   : > { %s1777_s28 = scalar_select %p119_p1, %s1544_s0, %s121_s8  }
  0x38   : > { %s2117_s29 = sadd.s32 1, %s1552_s20  ;;  %p1784_p3 = por %p138_p13, %p137_p12 }
  0x39   : > { %s1782_s6 = scalar_select %p93_p2, %s1552_s20, %s2117_s29  }
  0x3a   : > { %p1082_p4 = scmp.ge.s32.totalorder %s1580_s27, 4 }
  0x3c   : > { %154 = sbr.rel (%p1082_p4) target bundleno = 174 (0xae), region = 16 }
  0x43   : > { %157 = sbr.rel (!%p1722_p9) target bundleno = 156 (0x9c), region = 20  ;;  %s159_s3 = sand.u32 (%p1722_p9), 1, %s1560_s22  }
  0x44   : > { %s162_s23 = sld [smem:[#allocation4 + %s1576_s26]] (%p1722_p9)  ;;  %s1083_s24 = sshll.u32 (%p1722_p9), %s159_s3, 7 }
  0x45   : > { %s1203_s8 = smul.u32 (%p1722_p9), 50, %s1576_s26  ;;  %s2119_s1 = sld [smem:[#allocation16_spill]] (%p1722_p9) }
  0x4a   : > { %s1084_s4 = sadd.s32 4294967295, %s162_s23  ;;  %s1804_s23 = scalar_lea.vmem [#allocation5], %s1083_s24  }
  0x4b   : > { %p164_p1 = scmp.gt.s32.totalorder %s1084_s4, 0 }
  0x4d   : > { %s2160_s4 = smov (!%p164_p1, %s1084_s4), 0 }
  0x4e   : > { %p166_p5 = scmp.lt.s32.totalorder %s1572_s25, %s2160_s4 }
  0x50   : > { %s167_s12 = scalar_select %p166_p5, %s1572_s25, %s2160_s4 }
  0x52   : > { %s1086_s7 = sshll.u32 %s167_s12, 4 }
  0x53   : > { %s170_s9 = ssub.s32 25, %s1086_s7  ;;  %s176_s11 = sadd.s32 %s1203_s8, %s1086_s7 }
  0x54   : > { %p171_p6 = scmp.lt.s32.totalorder %s170_s9, 16  ;;  %s1090_s10 = sshll.u32 %s176_s11, 2 }
  0x55   : > { %s1799_s30 = scalar_lea.vmem %s2119_s1, %s1090_s10  }
  0x56   : > { %s2162_s9 = smov (!%p171_p6, %s170_s9), 16 }
  0x57   : > { %s1087_s3 = sshll.u32 %s2162_s9, 7 }
  0x58   : > { %p1091_p9 = scmp.eq.s32.totalorder %s1087_s3, 0 }
  0x59   : > { %s1807_s4 = sshrl.u32 (!%p1091_p9), %s2162_s9, 4 }
  0x5a   : > { %181 = sbr.rel (%p1091_p9) target bundleno = 156 (0x9c), region = 24  ;;  %p1092_p7 = scmp.le.s32.totalorder (!%p1091_p9), %s1807_s4, 0 }
  0x61   : > { %1014 = sbr.rel (%p1092_p7) target bundleno = 135 (0x87), region = 196  ;;  %s2120_s8 = smov (!%p1092_p7), %s1804_s23 }
  0x62   : > { %s2121_s12 = smov (!%p1092_p7), %s1799_s30  ;;  %s1816_s7 = smov (!%p1092_p7), 0  }
  0x63   : > { %s1818_s11 = smov (!%p1092_p7), 0  }
  0x68 LB: >> { %v197_v0 = vld [vmem:[%s1588_s12] sm:$0xf]  ;;  %v199_v1 = vld [vmem:[%s1588_s12 + $0x4] sm:$0xf]  ;;  %v201_v2 = vld [vmem:[%s1588_s12 + $0x8] sm:$0xf]  ;;  %s1596_s11 = sphi %s1818_s11, %s191_s11   ;;  %s1592_s7 = sphi %s1816_s7, %s2122_s7   ;;  %s1588_s12 = sphi %s2121_s12, %s266_s12   ;;  %s1584_s8 = sphi %s2120_s8, %s267_s8  }
  0x69   : >> { %198 = vst [vmem:[%s1584_s8] sm:$0xf] %v197_v0  ;;  %200 = vst [vmem:[%s1584_s8 + $0x4] sm:$0xf] %v199_v1  ;;  %v203_v3 = vld [vmem:[%s1588_s12 + $0xc] sm:$0xf]  ;;  %s261_s24 = sadd.s32 1, %s1592_s7 }
  0x6a   : >> { %202 = vst [vmem:[%s1584_s8 + $0x8] sm:$0xf] %v201_v2  ;;  %v205_v4 = vld [vmem:[%s1588_s12 + $0x10] sm:$0xf]  ;;  %v207_v5 = vld [vmem:[%s1588_s12 + $0x14] sm:$0xf]  ;;  %p262_p8 = scmp.ge.s32.totalorder %s261_s24, %s1807_s4 }
  0x6b   : >> { %204 = vst [vmem:[%s1584_s8 + $0xc] sm:$0xf] %v203_v3  ;;  %206 = vst [vmem:[%s1584_s8 + $0x10] sm:$0xf] %v205_v4  ;;  %v209_v6 = vld [vmem:[%s1588_s12 + $0x18] sm:$0xf] }
  0x6c   : >> { %208 = vst [vmem:[%s1584_s8 + $0x14] sm:$0xf] %v207_v5  ;;  %v211_v7 = vld [vmem:[%s1588_s12 + $0x1c] sm:$0xf]  ;;  %v213_v8 = vld [vmem:[%s1588_s12 + $0x20] sm:$0xf] }
  0x6d   : >> { %210 = vst [vmem:[%s1584_s8 + $0x18] sm:$0xf] %v209_v6  ;;  %212 = vst [vmem:[%s1584_s8 + $0x1c] sm:$0xf] %v211_v7  ;;  %v215_v9 = vld [vmem:[%s1588_s12 + $0x24] sm:$0xf] }
  0x6e   : >> { %214 = vst [vmem:[%s1584_s8 + $0x20] sm:$0xf] %v213_v8  ;;  %v217_v10 = vld [vmem:[%s1588_s12 + $0x28] sm:$0xf]  ;;  %v219_v11 = vld [vmem:[%s1588_s12 + $0x2c] sm:$0xf] }
  0x6f   : >> { %216 = vst [vmem:[%s1584_s8 + $0x24] sm:$0xf] %v215_v9  ;;  %218 = vst [vmem:[%s1584_s8 + $0x28] sm:$0xf] %v217_v10  ;;  %v221_v12 = vld [vmem:[%s1588_s12 + $0x30] sm:$0xf] }
  0x70   : >> { %220 = vst [vmem:[%s1584_s8 + $0x2c] sm:$0xf] %v219_v11  ;;  %v223_v13 = vld [vmem:[%s1588_s12 + $0x34] sm:$0xf]  ;;  %v225_v14 = vld [vmem:[%s1588_s12 + $0x38] sm:$0xf] }
  0x71   : >> { %222 = vst [vmem:[%s1584_s8 + $0x30] sm:$0xf] %v221_v12  ;;  %224 = vst [vmem:[%s1584_s8 + $0x34] sm:$0xf] %v223_v13  ;;  %v227_v15 = vld [vmem:[%s1588_s12 + $0x3c] sm:$0xf] }
  0x72   : >> { %226 = vst [vmem:[%s1584_s8 + $0x38] sm:$0xf] %v225_v14  ;;  %v229_v16 = vld [vmem:[%s1588_s12 + $0x64] sm:$0xf]  ;;  %v231_v17 = vld [vmem:[%s1588_s12 + $0x68] sm:$0xf] }
  0x73   : >> { %228 = vst [vmem:[%s1584_s8 + $0x3c] sm:$0xf] %v227_v15  ;;  %230 = vst [vmem:[%s1584_s8 + $0x40] sm:$0xf] %v229_v16  ;;  %v233_v18 = vld [vmem:[%s1588_s12 + $0x6c] sm:$0xf] }
  0x74   : >> { %232 = vst [vmem:[%s1584_s8 + $0x44] sm:$0xf] %v231_v17  ;;  %v235_v19 = vld [vmem:[%s1588_s12 + $0x70] sm:$0xf]  ;;  %v237_v20 = vld [vmem:[%s1588_s12 + $0x74] sm:$0xf] }
  0x75   : >> { %234 = vst [vmem:[%s1584_s8 + $0x48] sm:$0xf] %v233_v18  ;;  %236 = vst [vmem:[%s1584_s8 + $0x4c] sm:$0xf] %v235_v19  ;;  %v239_v21 = vld [vmem:[%s1588_s12 + $0x78] sm:$0xf] }
  0x76   : >> { %238 = vst [vmem:[%s1584_s8 + $0x50] sm:$0xf] %v237_v20  ;;  %v241_v22 = vld [vmem:[%s1588_s12 + $0x7c] sm:$0xf]  ;;  %v243_v23 = vld [vmem:[%s1588_s12 + $0x80] sm:$0xf] }
  0x77   : >> { %240 = vst [vmem:[%s1584_s8 + $0x54] sm:$0xf] %v239_v21  ;;  %242 = vst [vmem:[%s1584_s8 + $0x58] sm:$0xf] %v241_v22  ;;  %v245_v24 = vld [vmem:[%s1588_s12 + $0x84] sm:$0xf] }
  0x78   : >> { %244 = vst [vmem:[%s1584_s8 + $0x5c] sm:$0xf] %v243_v23  ;;  %v247_v25 = vld [vmem:[%s1588_s12 + $0x88] sm:$0xf]  ;;  %v249_v26 = vld [vmem:[%s1588_s12 + $0x8c] sm:$0xf] }
  0x79   : >> { %246 = vst [vmem:[%s1584_s8 + $0x60] sm:$0xf] %v245_v24  ;;  %248 = vst [vmem:[%s1584_s8 + $0x64] sm:$0xf] %v247_v25  ;;  %v251_v27 = vld [vmem:[%s1588_s12 + $0x90] sm:$0xf] }
  0x7a   : >> { %250 = vst [vmem:[%s1584_s8 + $0x68] sm:$0xf] %v249_v26  ;;  %v253_v28 = vld [vmem:[%s1588_s12 + $0x94] sm:$0xf]  ;;  %v255_v29 = vld [vmem:[%s1588_s12 + $0x98] sm:$0xf] }
  0x7b   : >> { %252 = vst [vmem:[%s1584_s8 + $0x6c] sm:$0xf] %v251_v27  ;;  %254 = vst [vmem:[%s1584_s8 + $0x70] sm:$0xf] %v253_v28  ;;  %v257_v30 = vld [vmem:[%s1588_s12 + $0x9c] sm:$0xf] }
  0x7c   : >> { %256 = vst [vmem:[%s1584_s8 + $0x74] sm:$0xf] %v255_v29  ;;  %v259_v31 = vld [vmem:[%s1588_s12 + $0xa0] sm:$0xf]  ;;  %258 = vst [vmem:[%s1584_s8 + $0x78] sm:$0xf] %v257_v30 }
  0x7d   : >> { %260 = vst [vmem:[%s1584_s8 + $0x7c] sm:$0xf] %v259_v31  ;;  %s2164_s24 = smov (%p262_p8, %s261_s24), 0  ;;  %s191_s11 = sadd.s32 1, %s1596_s11  }
  0x7e   : >> { %s1093_s10 = sshll.u32 %s2164_s24, 6  ;;  %p190_p10 = scmp.ge.s32.totalorder %s191_s11, %s1807_s4 }
  0x7f   : >> { %s266_s12 = scalar_lea.vmem %s1799_s30, %s1093_s10   ;;  %s267_s8 = scalar_lea.vmem %s1804_s23, %s1093_s10 [#allocation5]  }
  0x80   : >> { %s2122_s7 = smov %s2164_s24  ;;  %193 = sbr.rel (!%p190_p10) target bundleno = 104 (0x68), region = 202 }
  0x87 PF: > { %s1911_s5 = sand.u32 15, %s2162_s9   ;;  %s1141_s29 = sshll.u32 %s1807_s4, 6 }
  0x88   : > { %s1915_s3 = scalar_lea.vmem %s1799_s30, %s1141_s29   ;;  %s274_s10 = scalar_lea.vmem %s1804_s23, %s1141_s29 [#allocation5]  }
  0x89   : > { %p1098_p12 = scmp.le.s32.totalorder %s1911_s5, 0 }
  0x8a   : > { %s1598_s1 = smov (!%p1098_p12), %s274_s10   ;;  %s1602_s24 = smov (!%p1098_p12), %s1915_s3  }
  0x8b   : > { %1028 = sbr.rel (%p1098_p12) target bundleno = 156 (0x9c), region = 207  ;;  %s1606_s13 = smov (!%p1098_p12), 0  }
  0x8c   : > { %s1610_s11 = smov (!%p1098_p12), 0  }
  0x92 LB: >> { %v284_v32 = vld [vmem:[%s1604_s24] sm:$0xf]  ;;  %v286_v33 = vld [vmem:[%s1604_s24 + $0x64] sm:$0xf]  ;;  %s288_s30 = sadd.s32 1, %s1608_s13  ;;  %s278_s11 = sadd.s32 1, %s1612_s11   ;;  %s1612_s11 = sphi %s1610_s11, %s278_s11   ;;  %s1608_s13 = sphi %s1606_s13, %s1607_s13   ;;  %s1604_s24 = sphi %s1602_s24, %s293_s24   ;;  %s1600_s1 = sphi %s1598_s1, %s294_s1  }
  0x93   : >> { %285 = vst [vmem:[%s1600_s1] sm:$0xf] %v284_v32  ;;  %287 = vst [vmem:[%s1600_s1 + $0x40] sm:$0xf] %v286_v33  ;;  %p289_p13 = scmp.ge.s32.totalorder %s288_s30, %s1911_s5  ;;  %p277_p2 = scmp.ge.s32.totalorder %s278_s11, %s1911_s5 }
  0x95   : >> { %s2166_s30 = smov (%p289_p13, %s288_s30), 0  ;;  %280 = sbr.rel (!%p277_p2) target bundleno = 146 (0x92), region = 213 }
  0x96   : >> { %s1099_s9 = sshll.u32 %s2166_s30, 2  ;;  %s1607_s13 = smov %s2166_s30  }
  0x97   : >> { %s293_s24 = scalar_lea.vmem %s1915_s3, %s1099_s9   ;;  %s294_s1 = scalar_lea.vmem %s274_s10, %s1099_s9 [#allocation5]  }
  0x9c PF: > { %449 = sbr.rel (!%p1739_p0) target bundleno = 174 (0xae), region = 82  ;;  %s454_s13 = sld [smem:[#allocation4 + %s1576_s26]] (%p1739_p0) }
  0x9d   : > { %s451_s4 = sand.u32 (%p1739_p0), 1, %s1552_s20   ;;  %s1143_s8 = sshll.u32 (%p1739_p0), %s1576_s26, 2 }
  0x9e   : > { %s1101_s1 = sshll.u32 (%p1739_p0), %s451_s4, 1 }
  0x9f   : > { %s453_s3 = scalar_lea.vmem (%p1739_p0), [#allocation6], %s1101_s1 }
  0xa2   : > { %s1102_s23 = sadd.s32 (%p1739_p0), 4294967295, %s454_s13 }
  0xa3   : > { %p456_p4 = scmp.gt.s32.totalorder %s1102_s23, 0 }
  0xa5   : > { %s2168_s23 = smov (!%p456_p4, %s1102_s23), 0 }
  0xa6   : > { %p458_p1 = scmp.lt.s32.totalorder %s1572_s25, %s2168_s23 }
  0xa8   : > { %s459_s12 = scalar_select %p458_p1, %s1572_s25, %s2168_s23 }
  0xaa   : > { %s462_s7 = sadd.s32 %s1143_s8, %s459_s12 }
  0xab   : > { %s463_s15 = scalar_lea.vmem %s2100_s2, %s462_s7 }
  0xac   : > { %v479_v34 = vld [vmem:[%s463_s15] sm:$0x1]  ;;  %v481_v35 = vld [vmem:[%s463_s15 + $0x2] sm:$0x1] }
  0xad   : > { %480 = vst [vmem:[%s453_s3] sm:$0x1] %v479_v34  ;;  %482 = vst [vmem:[%s453_s3 + $0x1] sm:$0x1] %v481_v35 }
  0xae PF: > { %p1105_p0 = scmp.ge.s32.totalorder %s1580_s27, 1  ;;  %p500_p5 = scmp.lt.s32.totalorder %s1580_s27, 5 }
  0xb0   : > { %p501_p6 = pnand %p1105_p0, %p500_p5 }
  0xb1   : > { %s507_s10 = sand.u32 (!%p501_p6), 1, %s1556_s21   ;;  %s514_s24 = sand.u32 (!%p501_p6), 1, %s1548_s19  }
  0xb2   : > { %504 = sbr.rel (%p501_p6) target bundleno = 834 (0x342), region = 116  ;;  %s1106_s11 = sshll.u32 (!%p501_p6), %s507_s10, 7 }
  0xb3   : > { %s1937_s30 = sshll.u32 (!%p501_p6), %s514_s24, 1  ;;  %s536_s9 = sand.u32 (!%p501_p6), 1, %s1540_s18  }
  0xb4   : > { %s1108_s13 = sshll.u32 (!%p501_p6), %s536_s9, 1  ;;  %s1942_s23 = scalar_lea.vmem (!%p501_p6), [#allocation5], %s1106_s11 }
  0xb5   : > { %s516_s4 = scalar_lea.vmem (!%p501_p6), [#allocation6], %s1937_s30  ;;  %s1945_s1 = scalar_lea.vmem (!%p501_p6), [#allocation7], %s1108_s13 }
  0xb6   : > { %s2123_s8 = sld [smem:[#allocation11_spill]] (!%p501_p6) }
  0xbc   : > { %p1109_p9 = scmp.ne.s32.totalorder %s2123_s8, 0 }
  0xbd   : > { %vm564_vm0 = vcmask (!%p1109_p9), 778240   ;;  %vm567_vm1 = vcmask (!%p1109_p9), 0   ;;  %v1615_v36 = vmov (!%p1109_p9), 0.0  }
  0xbe   : > { %563 = sbr.rel (%p1109_p9) target bundleno = 197 (0xc5), region = 128  ;;  %565 = vst.msk [vmem:[%s1945_s1] sm:$0x1] (!%p1109_p9), %vm564_vm0, %v1615_v36  ;;  %566 = vst.msk [vmem:[%s1945_s1 + $0x1] sm:$0x1] (!%p1109_p9), %vm564_vm0, %v1615_v36 }
  0xbf   : > { %568 = vst.msk [vmem:[#allocation2] sm:$0x1] (!%p1109_p9), %vm567_vm1, %v1615_v36  ;;  %569 = vst.msk [vmem:[#allocation2 + $0x1] sm:$0x1] (!%p1109_p9), %vm567_vm1, %v1615_v36 }
  0xc5 PF: > { %s2124_s19 = sld [smem:[#allocation12_spill]]  ;;  %s2125_s12 = sld [smem:[#allocation11_spill]] }
  0xcb   : > { %s570_s21 = sld [smem:[#allocation4 + %s2124_s19]] }
  0xd1   : > { %p1110_p7 = scmp.ge.s32.totalorder %s2125_s12, %s570_s21 }
  0xd2   : > { %s2126_s7 = sld [smem:[#allocation11_spill]] (!%p1110_p7) }
  0xd3   : > { %574 = sbr.rel (%p1110_p7) target bundleno = 475 (0x1db), region = 132 }
  0xd8   : > { %p1111_p8 = scmp.ne.s32.totalorder (!%p1110_p7), %s2126_s7, 1 }
  0xda   : > { %578 = sbr.rel (%p1111_p8) target bundleno = 226 (0xe2), region = 136  ;;  %vm579_vm2 = vcmask (!%p1111_p8), 781312   ;;  %v1616_v37 = vmov (!%p1111_p8), 0  }
  0xdb   : > { %580 = vst.msk [vmem:[%s1942_s23 + $0x24] sm:$0xf] (!%p1111_p8), %vm579_vm2, %v1616_v37  ;;  %581 = vst.msk [vmem:[%s1942_s23 + $0x28] sm:$0xf] (!%p1111_p8), %vm579_vm2, %v1616_v37 }
  0xdc   : > { %582 = vst.msk [vmem:[%s1942_s23 + $0x2c] sm:$0xf] (!%p1111_p8), %vm579_vm2, %v1616_v37  ;;  %583 = vst.msk [vmem:[%s1942_s23 + $0x30] sm:$0xf] (!%p1111_p8), %vm579_vm2, %v1616_v37 }
  0xdd   : > { %584 = vst.msk [vmem:[%s1942_s23 + $0x34] sm:$0xf] (!%p1111_p8), %vm579_vm2, %v1616_v37  ;;  %585 = vst.msk [vmem:[%s1942_s23 + $0x38] sm:$0xf] (!%p1111_p8), %vm579_vm2, %v1616_v37 }
  0xde   : > { %586 = vst.msk [vmem:[%s1942_s23 + $0x3c] sm:$0xf] (!%p1111_p8), %vm579_vm2, %v1616_v37  ;;  %587 = vst.msk [vmem:[%s1942_s23 + $0x64] sm:$0xf] (!%p1111_p8), %vm579_vm2, %v1616_v37 }
  0xdf   : > { %588 = vst.msk [vmem:[%s1942_s23 + $0x68] sm:$0xf] (!%p1111_p8), %vm579_vm2, %v1616_v37  ;;  %589 = vst.msk [vmem:[%s1942_s23 + $0x6c] sm:$0xf] (!%p1111_p8), %vm579_vm2, %v1616_v37 }
  0xe0   : > { %590 = vst.msk [vmem:[%s1942_s23 + $0x70] sm:$0xf] (!%p1111_p8), %vm579_vm2, %v1616_v37  ;;  %591 = vst.msk [vmem:[%s1942_s23 + $0x74] sm:$0xf] (!%p1111_p8), %vm579_vm2, %v1616_v37 }
  0xe1   : > { %592 = vst.msk [vmem:[%s1942_s23 + $0x78] sm:$0xf] %vm579_vm2, %v1616_v37  ;;  %593 = vst.msk [vmem:[%s1942_s23 + $0x7c] sm:$0xf] %vm579_vm2, %v1616_v37 }
  0xe2 PF: > { %v1379_v38 = vld [vmem:[%s1942_s23] sm:$0xff]   ;;  %v1617_v39 = vmov 0.0   ;;  %s2127_s5 = sld [smem:[#allocation11_spill]]  ;;  %v1381_v41 = vld [vmem:[%s1942_s23 + $0x8] sm:$0xff]   ;;  %vm1618_vm3 = vmmov 0   ;;  %v1383_v43 = vld [vmem:[%s1942_s23 + $0x10] sm:$0xff]   ;;  %v597_v44 = vlaneseq }
  0xe3   : > { %1163 = vmatprep.subr.bf16.mxu0 %v1617_v39  ;;  %1183 = vmatprep.subr.bf16.mxu1 %v1617_v39  ;;  %v1380_v40 = vld [vmem:[%s1942_s23 + $0x40] sm:$0xff]   ;;  %v1382_v42 = vld [vmem:[%s1942_s23 + $0x48] sm:$0xff]   ;;  %v1384_v45 = vld [vmem:[%s1942_s23 + $0x50] sm:$0xff]   ;;  %vm825_vm4 = vcmask 1040384   ;;  %vm834_vm7 = vcmask 0   ;;  %vm820_vm8 = vcmask 778240  }
  0xe4   : > { %1164 = vmatpush3.bf16.msra.mxu0 %v1379_v38  ;;  %1179 = vmatprep.mubr.msk.bf16.mxu0 %vm1618_vm3, %v1617_v39  ;;  %v1385_v46 = vld [vmem:[%s1942_s23 + $0x18] sm:$0xff]   ;;  %v598_v47 = vand.u32 127, %v597_v44  ;;  %v1387_v50 = vld [vmem:[%s1942_s23 + $0x20] sm:$0xff]   ;;  %v1389_v57 = vld [vmem:[%s1942_s23 + $0x28] sm:$0xff]  }
  0xe5   : > { %1184 = vmatpush3.bf16.msra.mxu1 %v1380_v40  ;;  %1165 = vmatprep.subr.bf16.mxu0 %v1617_v39  ;;  %v1386_v48 = vld [vmem:[%s1942_s23 + $0x58] sm:$0xff]   ;;  %v594_v53 = vld [vmem:[%s516_s4] sm:$0x1]  ;;  %v595_v54 = vld [vmem:[%s516_s4 + $0x1] sm:$0x1] }
  0xe6   : > { %1185 = vmatprep.subr.bf16.mxu1 %v1617_v39  ;;  %1199 = vmatprep.mubr.msk.bf16.mxu1 %vm1618_vm3, %v1617_v39  ;;  %v1388_v52 = vld [vmem:[%s1942_s23 + $0x60] sm:$0xff]   ;;  %v602_v55 = vcvt.s32.f32 %v594_v53  ;;  %v603_v56 = vcvt.s32.f32 %v595_v54  ;;  %v1391_v62 = vld [vmem:[%s1942_s23 + $0x30] sm:$0xff]   ;;  %v1393_v1 = vld [vmem:[%s1942_s23 + $0x38] sm:$0xff]  }
  0xe7   : > { %v1390_v58 = vld [vmem:[%s1942_s23 + $0x68] sm:$0xff]   ;;  %v823_v5 = vld [vmem:[#allocation2] sm:$0x1]  ;;  %v824_v8 = vld [vmem:[#allocation2 + $0x1] sm:$0x1] }
  0xe8   : > { %1166 = vmatpush3.bf16.msra.mxu0 %v1381_v41  ;;  %s1112_s29 = sshll.u32 %s2127_s5, 7  ;;  %v1392_v0 = vld [vmem:[%s1942_s23 + $0x70] sm:$0xff]   ;;  %v1394_v2 = vld [vmem:[%s1942_s23 + $0x78] sm:$0xff]   ;;  %v1122_v3 = vpack.c.bf16 %v602_v55, %v602_v55  ;;  %v1133_v4 = vpack.c.bf16 %v603_v56, %v603_v56  ;;  %v816_v11 = vld [vmem:[%s1945_s1] sm:$0x1] }
  0xe9   : > { %1186 = vmatpush3.bf16.msra.mxu1 %v1382_v42  ;;  %1167 = vmatprep.subr.bf16.mxu0 %v1617_v39  ;;  %v599_v49 = vstv %s1112_s29  ;;  %v817_v12 = vld [vmem:[%s1945_s1 + $0x1] sm:$0x1] }
  0xea   : > { %1187 = vmatprep.subr.bf16.mxu1 %v1617_v39  ;;  %v600_v51 = vadd.s32 %v599_v49, %v598_v47 }
  0xec   : > { %1168 = vmatpush3.bf16.msra.mxu0 %v1383_v43  ;;  %vm601_vm5 = vcmp.lt.s32.totalorder %v600_v51, 200 }
  0xed   : > { %1188 = vmatpush3.bf16.msra.mxu1 %v1384_v45  ;;  %1169 = vmatprep.subr.bf16.mxu0 %v1617_v39  ;;  %v604_v59 = vsel %vm601_vm5, %v602_v55, 0.0  ;;  %v605_v60 = vsel %vm601_vm5, %v603_v56, 0.0  ;;  %vm1121_vm6 = vmpackc.low %vm601_vm5, %vm601_vm5 }
  0xee   : > { %1189 = vmatprep.subr.bf16.mxu1 %v1617_v39  ;;  %v826_v61 = vsel %vm825_vm4, %v604_v59, 0.0  ;;  %v829_v63 = vsel %vm825_vm4, %v605_v60, 0.0 }
  0xef   : > { %827 = vadd.xlane.f32.xlu0 %v826_v61 }
  0xf0   : > { %1170 = vmatpush3.bf16.msra.mxu0 %v1385_v46 }
  0xf1   : > { %1190 = vmatpush3.bf16.msra.mxu1 %v1386_v48  ;;  %1171 = vmatprep.subr.bf16.mxu0 %v1617_v39 }
  0xf2   : > { %1191 = vmatprep.subr.bf16.mxu1 %v1617_v39 }
  0xf3   : > { %830 = vadd.xlane.f32.xlu0 %v829_v63 }
  0xf4   : > { %1172 = vmatpush3.bf16.msra.mxu0 %v1387_v50 }
  0xf5   : > { %1192 = vmatpush3.bf16.msra.mxu1 %v1388_v52  ;;  %1173 = vmatprep.subr.bf16.mxu0 %v1617_v39 }
  0xf6   : > { %1193 = vmatprep.subr.bf16.mxu1 %v1617_v39 }
  0xf8   : > { %1174 = vmatpush3.bf16.msra.mxu0 %v1389_v57 }
  0xf9   : > { %1194 = vmatpush3.bf16.msra.mxu1 %v1390_v58  ;;  %1175 = vmatprep.subr.bf16.mxu0 %v1617_v39 }
  0xfa   : > { %1195 = vmatprep.subr.bf16.mxu1 %v1617_v39 }
  0xfc   : > { %1176 = vmatpush3.bf16.msra.mxu0 %v1391_v62 }
  0xfd   : > { %1196 = vmatpush3.bf16.msra.mxu1 %v1392_v0  ;;  %1177 = vmatprep.subr.bf16.mxu0 %v1617_v39 }
  0xfe   : > { %1197 = vmatprep.subr.bf16.mxu1 %v1617_v39 }
 0x100   : > { %1178 = vmatpush3.bf16.msra.mxu0 %v1393_v1 }
 0x101   : > { %1198 = vmatpush3.bf16.msra.mxu1 %v1394_v2 }
 0x103   : > { %1180 = vmatmul.mubr.msk.bf16.vlgmr.msra.gmra.mrb[0].mxu0 %vm1121_vm6, %v1122_v3 }
 0x104   : > { %1200 = vmatmul.mubr.msk.bf16.vlgmr.msra.gmra.mrb[0].mxu1 %vm1121_vm6, %v1133_v4 }
 0x17c   : > { %v828_v6 = vpop.xlane.xlu0 %827 }
 0x17d   : > { %v832_v7 = vadd.f32 %v828_v6, %v823_v5 }
 0x17f   : > { %835 = vst.msk [vmem:[#allocation2] sm:$0x1] %vm834_vm7, %v832_v7 }
 0x180   : > { %v831_v9 = vpop.xlane.xlu0 %830 }
 0x181   : > { %v833_v10 = vadd.f32 %v831_v9, %v824_v8 }
 0x183   : > { %836 = vst.msk [vmem:[#allocation2 + $0x1] sm:$0x1] %vm834_vm7, %v833_v10 }
 0x1d6   : > { %v722_v13 = vpop.f32.mrb[0].mxu0 }
 0x1d7   : > { %v818_v14 = vadd.f32 %v816_v11, %v722_v13  ;;  %v810_v15 = vpop.f32.mrb[0].mxu1  ;;  %v1181_v16 = vpop.f32.mrb[1].mxu0 }
 0x1d8   : > { %v819_v17 = vadd.f32 %v817_v12, %v810_v15  ;;  %v1201_v18 = vpop.f32.mrb[1].mxu1  ;;  %v725_v19 = vpop.f32.mrb[2].mxu0 }
 0x1d9   : > { %821 = vst.msk [vmem:[%s1945_s1] sm:$0x1] %vm820_vm8, %v818_v14  ;;  %v813_v20 = vpop.f32.mrb[2].mxu1  ;;  %v1182_v21 = vpop.f32.mrb[3].mxu0 }
 0x1da   : > { %822 = vst.msk [vmem:[%s1945_s1 + $0x1] sm:$0x1] %vm820_vm8, %v819_v17  ;;  %v1202_v22 = vpop.f32.mrb[3].mxu1 }
 0x1db PF: > { %s2128_s15 = sld [smem:[#allocation11_spill]] }
 0x1e1   : > { %p1135_p10 = scmp.ne.s32.totalorder %s2128_s15, 1 }
 0x1e2   : > { %v841_v23 = vld [vmem:[#allocation2] sm:$0x1] (!%p1135_p10)  ;;  %v842_v24 = vld [vmem:[#allocation2 + $0x1] sm:$0x1] (!%p1135_p10)  ;;  %v1619_v25 = vmov (!%p1135_p10), 0   ;;  %v854_v30 = vlaneseq (!%p1135_p10)  ;;  %vm871_vm9 = vcmask (!%p1135_p10), 778240  }
 0x1e3   : > { %840 = sbr.rel (%p1135_p10) target bundleno = 808 (0x328), region = 140  ;;  %1395 = vset.pattern.permute.xlu0 (!%p1135_p10), %v1619_v25  ;;  %v843_v26 = vmax.f32 (!%p1135_p10), %v841_v23, 1e-09  ;;  %v844_v27 = vmax.f32 (!%p1135_p10), %v842_v24, 1e-09 }
 0x1e4   : > { %v855_v31 = vshrl.u32 (!%p1135_p10), %v854_v30, 7  ;;  %v845_v33 = vld [vmem:[%s1945_s1] sm:$0x1] (!%p1135_p10)  ;;  %v846_v37 = vld [vmem:[%s1945_s1 + $0x1] sm:$0x1] (!%p1135_p10) }
 0x1e5   : > { %1396 = vrcp.f32 (!%p1135_p10), %v843_v26 }
 0x1e6   : > { %1398 = vrcp.f32 (!%p1135_p10), %v844_v27  ;;  %v856_v32 = vsub.s32 (!%p1135_p10), 0, %v855_v31 }
 0x1ef   : > { %v1397_v28 = vpop.eup %1396 }
 0x1f0   : > { %851 = vperm.xlu0 %1395, %v1397_v28   ;;  %v1399_v29 = vpop.eup %1398 }
 0x1f4   : > { %860 = vperm.xlu0 %1395, %v1399_v29  }
 0x26f   : > { %v852_v34 = vpop.permute.xlu0 %851 }
 0x270   : > { %v857_v35 = vrot.slane %v852_v34, %v856_v32 }
 0x272   : > { %v867_v36 = vmul.f32 %v857_v35, %v845_v33 }
 0x273   : > { %v861_v38 = vpop.permute.xlu0 %860 }
 0x274   : > { %v866_v39 = vrot.slane %v861_v38, %v856_v32  ;;  %v869_v40 = vmul.f32 %v867_v36, %v867_v36 }
 0x276   : > { %v868_v41 = vmul.f32 %v866_v39, %v846_v37  ;;  %v872_v42 = vsel %vm871_vm9, %v869_v40, 0.0 }
 0x277   : > { %873 = vadd.xlane.f32.xlu1 %v872_v42 }
 0x278   : > { %v870_v43 = vmul.f32 %v868_v41, %v868_v41 }
 0x27a   : > { %v875_v44 = vsel %vm871_vm9, %v870_v43, 0.0 }
 0x27b   : > { %876 = vadd.xlane.f32.xlu1 %v875_v44 }
 0x304   : > { %v874_v45 = vpop.xlane.xlu1 %873 }
 0x305   : > { %1400 = vrsqrt.f32 %v874_v45  ;;  %vm880_vm10 = vcmp.eq.f32.partialorder %v874_v45, inf  ;;  %v883_v49 = vand.u32 2147483648, %v874_v45  ;;  %vm882_vm11 = vcmp.eq.f32.partialorder %v874_v45, 0.0 }
 0x308   : > { %v877_v46 = vpop.xlane.xlu1 %876 }
 0x309   : > { %1402 = vrsqrt.f32 %v877_v46  ;;  %vm887_vm12 = vcmp.eq.f32.partialorder %v877_v46, inf  ;;  %v890_v55 = vand.u32 2147483648, %v877_v46  ;;  %vm889_vm13 = vcmp.eq.f32.partialorder %v877_v46, 0.0 }
 0x30f   : > { %v1401_v47 = vpop.eup %1400 }
 0x310   : > { %v879_v48 = vmul.f32 %v1401_v47, %v874_v45 }
 0x312   : > { %v881_v50 = vsel %vm880_vm10, %v874_v45, %v879_v48 }
 0x313   : > { %v1403_v51 = vpop.eup %1402  ;;  %v884_v52 = vsel %vm882_vm11, %v883_v49, %v881_v50 }
 0x314   : > { %v892_v53 = vmax.f32 %v884_v52, 1e-12  ;;  %v886_v54 = vmul.f32 %v1403_v51, %v877_v46 }
 0x316   : > { %1404 = vrcp.f32 %v892_v53  ;;  %v888_v56 = vsel %vm887_vm12, %v877_v46, %v886_v54 }
 0x317   : > { %v891_v57 = vsel %vm889_vm13, %v890_v55, %v888_v56 }
 0x318   : > { %v893_v58 = vmax.f32 %v891_v57, 1e-12 }
 0x31a   : > { %1406 = vrcp.f32 %v893_v58 }
 0x320   : > { %v1405_v59 = vpop.eup %1404 }
 0x321   : > { %v896_v60 = vmul.f32 %v1405_v59, %v867_v36 }
 0x323   : > { %898 = vst.msk [vmem:[%s1945_s1] sm:$0x1] %vm871_vm9, %v896_v60 }
 0x324   : > { %v1407_v61 = vpop.eup %1406 }
 0x325   : > { %v897_v62 = vmul.f32 %v1407_v61, %v868_v41 }
 0x327   : > { %899 = vst.msk [vmem:[%s1945_s1 + $0x1] sm:$0x1] %vm871_vm9, %v897_v62 }
 0x328 PF: > { %s2129_s3 = sld [smem:[#allocation12_spill]]  ;;  %s2130_s30 = sld [smem:[#allocation17_spill]] }
 0x329   : > { %s914_s23 = sshll.u32 %s1945_s1, 4  ;;  %s2034_s4 = scalar_lea.sflag [#allocation8], %s536_s9  ;;  %s2030_s23 = int_to_ptr.vmem [resolvable:$true] %s914_s23 }
 0x32a   : > { %s1420_s8 = scalar_lea.vmem %s2030_s23, 32  ;;  %s1620_s19 = smov [#allocation7]  }
 0x32b   : > { %p1421_p12 = scmp.ne.s32.totalorder %s2030_s23, %s1420_s8  ;;  %s1424_s21 = sshll.u32 %s1620_s19, 4  ;;  %s1425_s21 = int_to_ptr.vmem [resolvable:$false] %s1424_s21 }
 0x32c   : > { %s1426_s12 = scalar_lea.vmem %s1425_s21, 64  ;;  %p1427_p4 = scmp.lt.s32.totalorder %s2030_s23, %s1425_s21 }
 0x32d   : > { %p1422_p13 = pnand %p1421_p12, %p1759_p11  ;;  %p1428_p1 = scmp.lt.s32.totalorder %s1426_s12, %s1420_s8 }
 0x32e   : > { %s1144_s10 = sshll.u32 %s2129_s3, 5 }
 0x32f   : > { %s2027_s13 = scalar_lea.hbm %s2130_s30, %s1144_s10  ;;  %p1423_p2 = pneg %p1422_p13 }
 0x330   : > { %p1429_p0 = por %p1428_p1, %p1427_p4 }
 0x332   : > { %p1430_p5 = pnand %p1429_p0, %p1423_p2 }
 0x334   : > { %1433 = shalt.err (!%p1430_p5)
}
 0x335   : > { %s1434_s9 = scalar_lea.hbm %s2027_s13, 32  ;;  %s1438_s5 = scalar_lea.hbm %s2130_s30, 64 }
 0x336   : > { %p1435_p6 = scmp.ne.s32.totalorder %s2027_s13, %s1434_s9  ;;  %p1439_p8 = scmp.lt.u32.totalorder %s2027_s13, %s2130_s30 }
 0x337   : > { %p1440_p10 = scmp.lt.u32.totalorder %s1438_s5, %s1434_s9  ;;  %p1442_p13 = scmp.lt.u32.totalorder %s1434_s9, %s2027_s13 }
 0x338   : > { %p1436_p9 = pnand %p1435_p6, %p1759_p11 }
 0x339   : > { %p1441_p12 = por %p1440_p10, %p1439_p8 }
 0x33a   : > { %p1437_p7 = pneg %p1436_p9 }
 0x33b   : > { %p1443_p2 = por %p1442_p13, %p1441_p12 }
 0x33d   : > { %p1444_p4 = pnand %p1443_p2, %p1437_p7 }
 0x33f   : > { %1447 = shalt.err (!%p1444_p4)
}
 0x340   : > { %s1621_s3 = smov 16   ;;  %s1622_s10 = smov 1  }
 0x341   : > { %1204 = dma.vmem_to_hbm [thread:$0]  (%p1759_p11), %s2030_s23, 32, %s2027_s13, %s2034_s4, %s1621_s3, %s1621_s3, %s1622_s10  }
 0x342 PF: > { %p1210_p1 = scmp.ge.s32.totalorder %s1580_s27, 2  ;;  %s929_s24 = sand.u32 1, %s1536_s17  }
 0x343   : > { %s930_s11 = scalar_lea.sflag [#allocation8], %s929_s24 }
 0x344   : > { %p1207_p0 = pnand %p1210_p1, %p1784_p3 }
 0x346   : > { %1531 = dma.done.wait (!%p1207_p0), %s930_s11, 32  }
 0x347   : > { %1533 = vsyncadd (!%p1207_p0), %s930_s11, 4294967264  ;;  %s22_s27 = sadd.s32 1, %s1580_s27   ;;  %s2131_s14 = sld [smem:[#allocation15_spill]] }
 0x348   : > { %p19_p5 = scmp.ge.s32.totalorder %s22_s27, 6   ;;  %s2132_s13 = sld [smem:[#allocation13_spill]] }
 0x349   : > { %s2133_s4 = sld [smem:[#allocation14_spill]]  ;;  %s2134_s17 = smov %s1540_s18 }
 0x34a   : > { %s2135_s18 = smov %s1544_s0  ;;  %s2136_s0 = smov %s1777_s28 }
 0x34b   : > { %s2137_s19 = smov %s1552_s20  ;;  %s2138_s20 = smov %s1782_s6 }
 0x34c   : > { %s2139_s21 = smov %s1560_s22  ;;  %s2141_s23 = smov %s1572_s25 }
 0x34d   : > { %s2140_s22 = smov %s2131_s14  ;;  %s2142_s24 = smov %s1576_s26 }
 0x34e   : > { %s2143_s25 = smov %s2132_s13  ;;  %21 = sbr.rel (!%p19_p5) target bundleno = 23 (0x17), region = 224 }
 0x34f   : > { %s2144_s26 = smov %s2133_s4 }
 0x355   :  { %935 = vsyncpa [#allocation8], 1 }
 0x356   :  { %937 = vsyncpa [#allocation8 + $0x1], 1 }

</bundles_post_ra>
